<compile_context>
chip_gen: v7x
topology: tpu7x:2x2x1
jax: 0.10.0
libtpu: 0.0.40
codegen_flags: <defaults>
</compile_context>

<pallas_src>
import functools

import jax
import jax.numpy as jnp
from jax.experimental import pallas as pl
from jax.experimental.pallas import tpu as pltpu


# ---------------------------------------------------------------------------
# Fused Pallas kernel (one batch-chunk of images, folded onto lanes, per step)
# ---------------------------------------------------------------------------

def _bottleneck_kernel(x_ref, mask_ref, w1_ref, b1_ref, w2_ref, b2_ref,
                       w3_ref, b3_ref, o_ref, *, W):
    """Fused RegularBottleneck forward.

    Layouts (channel-major, images folded onto the lane axis, L = NB*H*W):
      x_ref   : (C,  L)    input (also the residual "main" branch)
      mask_ref: (9,  L)    precomputed 3x3 zero-padding border masks (f32)
      w1_ref  : (Ci, C)    1x1 conv, BN folded      b1_ref: (Ci, 1)
      w2_ref  : (9, Ci,Ci) 3x3 conv taps, BN folded b2_ref: (Ci, 1)
      w3_ref  : (C,  Ci)   1x1 conv, BN folded      b3_ref: (C, 1)
      o_ref   : (C,  L)    output
    """
    L = x_ref.shape[-1]
    f32 = jnp.float32

    x = x_ref[...]                         # (C, L)
    masks = mask_ref[...]                  # (9, L)
    w1 = w1_ref[...]                       # (Ci, C)
    w2 = w2_ref[...]                       # (9, Ci, Ci)
    w3 = w3_ref[...]                       # (C, Ci)

    # ---- ext_conv1: 1x1 conv + BN(folded) + ReLU  (MXU) -------------------
    h1 = jnp.maximum(
        jnp.dot(w1, x, preferred_element_type=f32) + b1_ref[...], 0.0)  # (Ci,L)

    # ---- ext_conv2: 3x3 conv (padding=1) + BN(folded) + ReLU --------------
    # Each tap is a lane rotation (XLU) of the flat (y*W + x) axis; taps that
    # fall outside an image (zero padding, incl. roll wrap-around across
    # folded images) are zeroed by the precomputed masks.  Masking after the
    # dot is mathematically identical (mask is lane-wise, independent of k,c).
    taps = [(dy, dx) for dy in (-1, 0, 1) for dx in (-1, 0, 1)]
    acc = jnp.dot(w2[4], h1, preferred_element_type=f32)   # center tap, mask==1
    for t, (dy, dx) in enumerate(taps):
        if dy == 0 and dx == 0:
            continue
        off = dy * W + dx                   # flat source offset of this tap
        tap = pltpu.roll(h1, shift=(-off) % L, axis=1)
        acc = acc + jnp.dot(w2[t], tap,
                            preferred_element_type=f32) * masks[t:t + 1, :]
    h2 = jnp.maximum(acc + b2_ref[...], 0.0)                # (Ci, L)

    # ---- ext_conv3 + Dropout2d(p=0) identity + residual + out ReLU --------
    ext = jnp.maximum(
        jnp.dot(w3, h2, preferred_element_type=f32) + b3_ref[...], 0.0)  # (C,L)
    o_ref[...] = jnp.maximum(ext + x, 0.0)                  # lane-dense store


# ---------------------------------------------------------------------------
# Host helpers
# ---------------------------------------------------------------------------

def _make_border_masks(H, W, images_per_step):
    """(9, images_per_step*H*W) f32 validity masks for the nine 3x3 taps."""
    yy, xx = jnp.divmod(jnp.arange(H * W, dtype=jnp.int32), W)
    rows = []
    for dy in (-1, 0, 1):
        for dx in (-1, 0, 1):
            valid = ((yy + dy >= 0) & (yy + dy < H) &
                     (xx + dx >= 0) & (xx + dx < W))
            rows.append(valid)
    m = jnp.stack(rows).astype(jnp.float32)          # (9, H*W)
    return jnp.tile(m, (1, images_per_step))         # (9, NB*H*W)


def regular_bottleneck_forward(x_nchw, params, images_per_step=None):
    N, C, H, W = x_nchw.shape
    HW = H * W
    Ci = params["w1"].shape[0]

    if images_per_step is None:
        images_per_step = N                 # fold whole batch for small shapes
    assert N % images_per_step == 0
    NB = images_per_step
    n_steps = N // NB
    L = NB * HW                             # lanes per grid step (mult. of 128)

    # Channel-major with the batch-chunk folded onto lanes:
    # (n_steps, C, NB*HW); lane order is image-major within a chunk.
    x3 = (x_nchw.astype(jnp.float32)
          .reshape(n_steps, NB, C, HW)
          .transpose(0, 2, 1, 3)
          .reshape(n_steps, C, L))

    masks = _make_border_masks(H, W, NB)    # (9, L), resident across steps

    out3 = pl.pallas_call(
        functools.partial(_bottleneck_kernel, W=W),
        grid=(n_steps,),
        in_specs=[
            pl.BlockSpec((None, C, L), lambda n: (n, 0, 0)),   # x chunk
            pl.BlockSpec((9, L), lambda n: (0, 0)),            # border masks
            pl.BlockSpec((Ci, C), lambda n: (0, 0)),           # w1
            pl.BlockSpec((Ci, 1), lambda n: (0, 0)),           # b1
            pl.BlockSpec((9, Ci, Ci), lambda n: (0, 0, 0)),    # w2
            pl.BlockSpec((Ci, 1), lambda n: (0, 0)),           # b2
            pl.BlockSpec((C, Ci), lambda n: (0, 0)),           # w3
            pl.BlockSpec((C, 1), lambda n: (0, 0)),            # b3
        ],
        out_specs=pl.BlockSpec((None, C, L), lambda n: (n, 0, 0)),
        out_shape=jax.ShapeDtypeStruct((n_steps, C, L), jnp.float32),
        compiler_params=pltpu.CompilerParams(
            dimension_semantics=("parallel",)),
    )(x3, masks, params["w1"], params["b1"], params["w2"], params["b2"],
      params["w3"], params["b3"])

    return (out3.reshape(n_steps, C, NB, HW)
            .transpose(0, 2, 1, 3)
            .reshape(N, C, H, W))


# ---------------------------------------------------------------------------
# Deterministic synthetic parameters with BatchNorm folded in
# ---------------------------------------------------------------------------

def make_params(key, channels, internal_channels):
    C, Ci = channels, internal_channels
    ks = jax.random.split(key, 6)
    f32 = jnp.float32

    # Conv weights, channel-major: (Cout, Cin) for 1x1; (kh*kw, Cout, Cin)
    # for the 3x3 (tap index t = (dy+1)*3 + (dx+1)).
    w1 = 0.1 * jax.random.normal(ks[0], (Ci, C), f32)
    w2 = 0.1 * jax.random.normal(ks[1], (9, Ci, Ci), f32)
    w3 = 0.1 * jax.random.normal(ks[2], (C, Ci), f32)

    def bn(k, c, eps=1e-5):
        kg, kb, km, kv = jax.random.split(k, 4)
        gamma = 0.5 + jax.random.uniform(kg, (c,), f32)
        beta = 0.1 * jax.random.normal(kb, (c,), f32)
        mean = 0.1 * jax.random.normal(km, (c,), f32)
        var = 0.5 + jax.random.uniform(kv, (c,), f32)
        scale = gamma / jnp.sqrt(var + eps)
        return scale, beta - mean * scale

    s1, t1 = bn(ks[3], Ci)
    s2, t2 = bn(ks[4], Ci)
    s3, t3 = bn(ks[5], C)

    return dict(
        w1=w1 * s1[:, None],        b1=t1.reshape(Ci, 1),
        w2=w2 * s2[None, :, None],  b2=t2.reshape(Ci, 1),
        w3=w3 * s3[:, None],        b3=t3.reshape(C, 1),
    )


# ---------------------------------------------------------------------------
# Pure-JAX reference for validation
# ---------------------------------------------------------------------------

def _reference_forward(x_nchw, params):
    dn = ("NCHW", "OIHW", "NCHW")
    prec = jax.lax.Precision.HIGHEST

    def conv(x, w, b, pad):
        y = jax.lax.conv_general_dilated(x, w, (1, 1), pad,
                                         dimension_numbers=dn, precision=prec)
        return jnp.maximum(y + b.reshape(1, -1, 1, 1), 0.0)

    Ci = params["w1"].shape[0]
    w1 = params["w1"][:, :, None, None]                               # OIHW
    w2 = jnp.transpose(params["w2"].reshape(3, 3, Ci, Ci), (2, 3, 0, 1))
    w3 = params["w3"][:, :, None, None]

    h1 = conv(x_nchw, w1, params["b1"], [(0, 0), (0, 0)])
    h2 = conv(h1, w2, params["b2"], [(1, 1), (1, 1)])
    ext = conv(h2, w3, params["b3"], [(0, 0), (0, 0)])
    return jnp.maximum(x_nchw + ext, 0.0)


if __name__ == "__main__":
    channels, internal_ratio = 16, 4
    N, H, W = 2, 16, 16

    key = jax.random.PRNGKey(0)
    kx, kp = jax.random.split(key)
    x = jax.random.normal(kx, (N, channels, H, W), jnp.float32)
    params = make_params(kp, channels, channels // internal_ratio)

    out = jax.block_until_ready(regular_bottleneck_forward(x, params))
    ref = jax.block_until_ready(_reference_forward(x, params))

    assert out.shape == (N, channels, H, W)
    # Tolerance covers the MXU's multi-pass f32 matmul vs the HIGHEST-precision
    # XLA reference; any structural bug (wrong tap/mask/BN/residual) is O(0.1+).
    assert jnp.allclose(out, ref, atol=5e-3, rtol=5e-3), "mismatch vs reference"

    print("KERNEL_OK")
</pallas_src>

<mosaic_0001>
module attributes {stable_mosaic.version = 11 : i64} {
  func.func @_bottleneck_kernel(%arg0: i32, %arg1: memref<1x16x512xf32, #tpu.memory_space<vmem>>, %arg2: memref<9x512xf32, #tpu.memory_space<vmem>>, %arg3: memref<4x16xf32, #tpu.memory_space<vmem>>, %arg4: memref<4x1xf32, #tpu.memory_space<vmem>>, %arg5: memref<9x4x4xf32, #tpu.memory_space<vmem>>, %arg6: memref<4x1xf32, #tpu.memory_space<vmem>>, %arg7: memref<16x4xf32, #tpu.memory_space<vmem>>, %arg8: memref<16x1xf32, #tpu.memory_space<vmem>>, %arg9: memref<1x16x512xf32, #tpu.memory_space<vmem>>) attributes {dimension_semantics = [#tpu.dimension_semantics<parallel>], iteration_bounds = array<i64: 1>, scalar_prefetch = 0 : i64, scratch_operands = 0 : i64, tpu.core_type = #tpu.core_type<tc>, window_params = [{transform_indices = @transform_0, window_bounds = array<i64: 1, 16, 512>}, {pipeline_mode = #tpu.pipeline_mode<synchronous>, transform_indices = @transform_1, window_bounds = array<i64: 9, 512>}, {pipeline_mode = #tpu.pipeline_mode<synchronous>, transform_indices = @transform_2, window_bounds = array<i64: 4, 16>}, {pipeline_mode = #tpu.pipeline_mode<synchronous>, transform_indices = @transform_3, window_bounds = array<i64: 4, 1>}, {pipeline_mode = #tpu.pipeline_mode<synchronous>, transform_indices = @transform_4, window_bounds = array<i64: 9, 4, 4>}, {pipeline_mode = #tpu.pipeline_mode<synchronous>, transform_indices = @transform_5, window_bounds = array<i64: 4, 1>}, {pipeline_mode = #tpu.pipeline_mode<synchronous>, transform_indices = @transform_6, window_bounds = array<i64: 16, 4>}, {pipeline_mode = #tpu.pipeline_mode<synchronous>, transform_indices = @transform_7, window_bounds = array<i64: 16, 1>}, {transform_indices = @transform_8, window_bounds = array<i64: 1, 16, 512>}]} {
    %c0 = arith.constant 0 : index
    %c0_0 = arith.constant 0 : index
    %c0_1 = arith.constant 0 : index
    %0 = vector.load %arg1[%c0, %c0_0, %c0_1] : memref<1x16x512xf32, #tpu.memory_space<vmem>>, vector<1x16x512xf32>
    %1 = vector.shape_cast %0 : vector<1x16x512xf32> to vector<16x512xf32>
    %c0_2 = arith.constant 0 : index
    %c0_3 = arith.constant 0 : index
    %2 = vector.load %arg2[%c0_2, %c0_3] : memref<9x512xf32, #tpu.memory_space<vmem>>, vector<9x512xf32>
    %c0_4 = arith.constant 0 : index
    %c0_5 = arith.constant 0 : index
    %3 = vector.load %arg3[%c0_4, %c0_5] : memref<4x16xf32, #tpu.memory_space<vmem>>, vector<4x16xf32>
    %c0_6 = arith.constant 0 : index
    %c0_7 = arith.constant 0 : index
    %c0_8 = arith.constant 0 : index
    %4 = vector.load %arg5[%c0_6, %c0_7, %c0_8] : memref<9x4x4xf32, #tpu.memory_space<vmem>>, vector<9x4x4xf32>
    %c0_9 = arith.constant 0 : index
    %c0_10 = arith.constant 0 : index
    %5 = vector.load %arg7[%c0_9, %c0_10] : memref<16x4xf32, #tpu.memory_space<vmem>>, vector<16x4xf32>
    %cst = arith.constant dense<0.000000e+00> : vector<4x512xf32>
    %6 = tpu.matmul %3, %1, %cst {dimension_numbers = #tpu.dot_dimension_numbers<[1], [0], [0], [1], [0, 0, 1, 1], [], []>} : vector<4x16xf32>, vector<16x512xf32>, vector<4x512xf32> -> vector<4x512xf32>
    %c0_11 = arith.constant 0 : index
    %c0_12 = arith.constant 0 : index
    %7 = vector.load %arg4[%c0_11, %c0_12] : memref<4x1xf32, #tpu.memory_space<vmem>>, vector<4x1xf32>
    %8 = vector.broadcast %7 : vector<4x1xf32> to vector<4x512xf32>
    %9 = arith.addf %6, %8 : vector<4x512xf32>
    %cst_13 = arith.constant 0.000000e+00 : f32
    %10 = vector.broadcast %cst_13 : f32 to vector<4x512xf32>
    %11 = arith.maximumf %9, %10 : vector<4x512xf32>
    %12 = vector.extract_strided_slice %4 {offsets = [4, 0, 0], sizes = [1, 4, 4], strides = [1, 1, 1]} : vector<9x4x4xf32> to vector<1x4x4xf32>
    %13 = vector.shape_cast %12 : vector<1x4x4xf32> to vector<4x4xf32>
    %cst_14 = arith.constant dense<0.000000e+00> : vector<4x512xf32>
    %14 = tpu.matmul %13, %11, %cst_14 {dimension_numbers = #tpu.dot_dimension_numbers<[1], [0], [0], [1], [0, 0, 1, 1], [], []>} : vector<4x4xf32>, vector<4x512xf32>, vector<4x512xf32> -> vector<4x512xf32>
    %c17_i32 = arith.constant 17 : i32
    %15 = tpu.dynamic_rotate %11 by %c17_i32 dim 1 : vector<4x512xf32>, i32 -> vector<4x512xf32>
    %16 = vector.extract_strided_slice %4 {offsets = [0, 0, 0], sizes = [1, 4, 4], strides = [1, 1, 1]} : vector<9x4x4xf32> to vector<1x4x4xf32>
    %17 = vector.shape_cast %16 : vector<1x4x4xf32> to vector<4x4xf32>
    %cst_15 = arith.constant dense<0.000000e+00> : vector<4x512xf32>
    %18 = tpu.matmul %17, %15, %cst_15 {dimension_numbers = #tpu.dot_dimension_numbers<[1], [0], [0], [1], [0, 0, 1, 1], [], []>} : vector<4x4xf32>, vector<4x512xf32>, vector<4x512xf32> -> vector<4x512xf32>
    %19 = vector.extract_strided_slice %2 {offsets = [0, 0], sizes = [1, 512], strides = [1, 1]} : vector<9x512xf32> to vector<1x512xf32>
    %20 = vector.broadcast %19 : vector<1x512xf32> to vector<4x512xf32>
    %21 = arith.mulf %18, %20 : vector<4x512xf32>
    %22 = arith.addf %14, %21 : vector<4x512xf32>
    %c16_i32 = arith.constant 16 : i32
    %23 = tpu.dynamic_rotate %11 by %c16_i32 dim 1 : vector<4x512xf32>, i32 -> vector<4x512xf32>
    %24 = vector.extract_strided_slice %4 {offsets = [1, 0, 0], sizes = [1, 4, 4], strides = [1, 1, 1]} : vector<9x4x4xf32> to vector<1x4x4xf32>
    %25 = vector.shape_cast %24 : vector<1x4x4xf32> to vector<4x4xf32>
    %cst_16 = arith.constant dense<0.000000e+00> : vector<4x512xf32>
    %26 = tpu.matmul %25, %23, %cst_16 {dimension_numbers = #tpu.dot_dimension_numbers<[1], [0], [0], [1], [0, 0, 1, 1], [], []>} : vector<4x4xf32>, vector<4x512xf32>, vector<4x512xf32> -> vector<4x512xf32>
    %27 = vector.extract_strided_slice %2 {offsets = [1, 0], sizes = [1, 512], strides = [1, 1]} : vector<9x512xf32> to vector<1x512xf32>
    %28 = vector.broadcast %27 : vector<1x512xf32> to vector<4x512xf32>
    %29 = arith.mulf %26, %28 : vector<4x512xf32>
    %30 = arith.addf %22, %29 : vector<4x512xf32>
    %c15_i32 = arith.constant 15 : i32
    %31 = tpu.dynamic_rotate %11 by %c15_i32 dim 1 : vector<4x512xf32>, i32 -> vector<4x512xf32>
    %32 = vector.extract_strided_slice %4 {offsets = [2, 0, 0], sizes = [1, 4, 4], strides = [1, 1, 1]} : vector<9x4x4xf32> to vector<1x4x4xf32>
    %33 = vector.shape_cast %32 : vector<1x4x4xf32> to vector<4x4xf32>
    %cst_17 = arith.constant dense<0.000000e+00> : vector<4x512xf32>
    %34 = tpu.matmul %33, %31, %cst_17 {dimension_numbers = #tpu.dot_dimension_numbers<[1], [0], [0], [1], [0, 0, 1, 1], [], []>} : vector<4x4xf32>, vector<4x512xf32>, vector<4x512xf32> -> vector<4x512xf32>
    %35 = vector.extract_strided_slice %2 {offsets = [2, 0], sizes = [1, 512], strides = [1, 1]} : vector<9x512xf32> to vector<1x512xf32>
    %36 = vector.broadcast %35 : vector<1x512xf32> to vector<4x512xf32>
    %37 = arith.mulf %34, %36 : vector<4x512xf32>
    %38 = arith.addf %30, %37 : vector<4x512xf32>
    %c1_i32 = arith.constant 1 : i32
    %39 = tpu.dynamic_rotate %11 by %c1_i32 dim 1 : vector<4x512xf32>, i32 -> vector<4x512xf32>
    %40 = vector.extract_strided_slice %4 {offsets = [3, 0, 0], sizes = [1, 4, 4], strides = [1, 1, 1]} : vector<9x4x4xf32> to vector<1x4x4xf32>
    %41 = vector.shape_cast %40 : vector<1x4x4xf32> to vector<4x4xf32>
    %cst_18 = arith.constant dense<0.000000e+00> : vector<4x512xf32>
    %42 = tpu.matmul %41, %39, %cst_18 {dimension_numbers = #tpu.dot_dimension_numbers<[1], [0], [0], [1], [0, 0, 1, 1], [], []>} : vector<4x4xf32>, vector<4x512xf32>, vector<4x512xf32> -> vector<4x512xf32>
    %43 = vector.extract_strided_slice %2 {offsets = [3, 0], sizes = [1, 512], strides = [1, 1]} : vector<9x512xf32> to vector<1x512xf32>
    %44 = vector.broadcast %43 : vector<1x512xf32> to vector<4x512xf32>
    %45 = arith.mulf %42, %44 : vector<4x512xf32>
    %46 = arith.addf %38, %45 : vector<4x512xf32>
    %c511_i32 = arith.constant 511 : i32
    %47 = tpu.dynamic_rotate %11 by %c511_i32 dim 1 : vector<4x512xf32>, i32 -> vector<4x512xf32>
    %48 = vector.extract_strided_slice %4 {offsets = [5, 0, 0], sizes = [1, 4, 4], strides = [1, 1, 1]} : vector<9x4x4xf32> to vector<1x4x4xf32>
    %49 = vector.shape_cast %48 : vector<1x4x4xf32> to vector<4x4xf32>
    %cst_19 = arith.constant dense<0.000000e+00> : vector<4x512xf32>
    %50 = tpu.matmul %49, %47, %cst_19 {dimension_numbers = #tpu.dot_dimension_numbers<[1], [0], [0], [1], [0, 0, 1, 1], [], []>} : vector<4x4xf32>, vector<4x512xf32>, vector<4x512xf32> -> vector<4x512xf32>
    %51 = vector.extract_strided_slice %2 {offsets = [5, 0], sizes = [1, 512], strides = [1, 1]} : vector<9x512xf32> to vector<1x512xf32>
    %52 = vector.broadcast %51 : vector<1x512xf32> to vector<4x512xf32>
    %53 = arith.mulf %50, %52 : vector<4x512xf32>
    %54 = arith.addf %46, %53 : vector<4x512xf32>
    %c497_i32 = arith.constant 497 : i32
    %55 = tpu.dynamic_rotate %11 by %c497_i32 dim 1 : vector<4x512xf32>, i32 -> vector<4x512xf32>
    %56 = vector.extract_strided_slice %4 {offsets = [6, 0, 0], sizes = [1, 4, 4], strides = [1, 1, 1]} : vector<9x4x4xf32> to vector<1x4x4xf32>
    %57 = vector.shape_cast %56 : vector<1x4x4xf32> to vector<4x4xf32>
    %cst_20 = arith.constant dense<0.000000e+00> : vector<4x512xf32>
    %58 = tpu.matmul %57, %55, %cst_20 {dimension_numbers = #tpu.dot_dimension_numbers<[1], [0], [0], [1], [0, 0, 1, 1], [], []>} : vector<4x4xf32>, vector<4x512xf32>, vector<4x512xf32> -> vector<4x512xf32>
    %59 = vector.extract_strided_slice %2 {offsets = [6, 0], sizes = [1, 512], strides = [1, 1]} : vector<9x512xf32> to vector<1x512xf32>
    %60 = vector.broadcast %59 : vector<1x512xf32> to vector<4x512xf32>
    %61 = arith.mulf %58, %60 : vector<4x512xf32>
    %62 = arith.addf %54, %61 : vector<4x512xf32>
    %c496_i32 = arith.constant 496 : i32
    %63 = tpu.dynamic_rotate %11 by %c496_i32 dim 1 : vector<4x512xf32>, i32 -> vector<4x512xf32>
    %64 = vector.extract_strided_slice %4 {offsets = [7, 0, 0], sizes = [1, 4, 4], strides = [1, 1, 1]} : vector<9x4x4xf32> to vector<1x4x4xf32>
    %65 = vector.shape_cast %64 : vector<1x4x4xf32> to vector<4x4xf32>
    %cst_21 = arith.constant dense<0.000000e+00> : vector<4x512xf32>
    %66 = tpu.matmul %65, %63, %cst_21 {dimension_numbers = #tpu.dot_dimension_numbers<[1], [0], [0], [1], [0, 0, 1, 1], [], []>} : vector<4x4xf32>, vector<4x512xf32>, vector<4x512xf32> -> vector<4x512xf32>
    %67 = vector.extract_strided_slice %2 {offsets = [7, 0], sizes = [1, 512], strides = [1, 1]} : vector<9x512xf32> to vector<1x512xf32>
    %68 = vector.broadcast %67 : vector<1x512xf32> to vector<4x512xf32>
    %69 = arith.mulf %66, %68 : vector<4x512xf32>
    %70 = arith.addf %62, %69 : vector<4x512xf32>
    %c495_i32 = arith.constant 495 : i32
    %71 = tpu.dynamic_rotate %11 by %c495_i32 dim 1 : vector<4x512xf32>, i32 -> vector<4x512xf32>
    %72 = vector.extract_strided_slice %4 {offsets = [8, 0, 0], sizes = [1, 4, 4], strides = [1, 1, 1]} : vector<9x4x4xf32> to vector<1x4x4xf32>
    %73 = vector.shape_cast %72 : vector<1x4x4xf32> to vector<4x4xf32>
    %cst_22 = arith.constant dense<0.000000e+00> : vector<4x512xf32>
    %74 = tpu.matmul %73, %71, %cst_22 {dimension_numbers = #tpu.dot_dimension_numbers<[1], [0], [0], [1], [0, 0, 1, 1], [], []>} : vector<4x4xf32>, vector<4x512xf32>, vector<4x512xf32> -> vector<4x512xf32>
    %75 = vector.extract_strided_slice %2 {offsets = [8, 0], sizes = [1, 512], strides = [1, 1]} : vector<9x512xf32> to vector<1x512xf32>
    %76 = vector.broadcast %75 : vector<1x512xf32> to vector<4x512xf32>
    %77 = arith.mulf %74, %76 : vector<4x512xf32>
    %78 = arith.addf %70, %77 : vector<4x512xf32>
    %c0_23 = arith.constant 0 : index
    %c0_24 = arith.constant 0 : index
    %79 = vector.load %arg6[%c0_23, %c0_24] : memref<4x1xf32, #tpu.memory_space<vmem>>, vector<4x1xf32>
    %80 = vector.broadcast %79 : vector<4x1xf32> to vector<4x512xf32>
    %81 = arith.addf %78, %80 : vector<4x512xf32>
    %cst_25 = arith.constant 0.000000e+00 : f32
    %82 = vector.broadcast %cst_25 : f32 to vector<4x512xf32>
    %83 = arith.maximumf %81, %82 : vector<4x512xf32>
    %cst_26 = arith.constant dense<0.000000e+00> : vector<16x512xf32>
    %84 = tpu.matmul %5, %83, %cst_26 {dimension_numbers = #tpu.dot_dimension_numbers<[1], [0], [0], [1], [0, 0, 1, 1], [], []>} : vector<16x4xf32>, vector<4x512xf32>, vector<16x512xf32> -> vector<16x512xf32>
    %c0_27 = arith.constant 0 : index
    %c0_28 = arith.constant 0 : index
    %85 = vector.load %arg8[%c0_27, %c0_28] : memref<16x1xf32, #tpu.memory_space<vmem>>, vector<16x1xf32>
    %86 = vector.broadcast %85 : vector<16x1xf32> to vector<16x512xf32>
    %87 = arith.addf %84, %86 : vector<16x512xf32>
    %cst_29 = arith.constant 0.000000e+00 : f32
    %88 = vector.broadcast %cst_29 : f32 to vector<16x512xf32>
    %89 = arith.maximumf %87, %88 : vector<16x512xf32>
    %90 = arith.addf %89, %1 : vector<16x512xf32>
    %cst_30 = arith.constant 0.000000e+00 : f32
    %91 = vector.broadcast %cst_30 : f32 to vector<16x512xf32>
    %92 = arith.maximumf %90, %91 : vector<16x512xf32>
    %c0_31 = arith.constant 0 : index
    %c0_32 = arith.constant 0 : index
    %c0_33 = arith.constant 0 : index
    %93 = vector.load %arg9[%c0_31, %c0_32, %c0_33] : memref<1x16x512xf32, #tpu.memory_space<vmem>>, vector<1x16x512xf32>
    %94 = vector.shape_cast %93 : vector<1x16x512xf32> to vector<16x512xf32>
    %95 = vector.shape_cast %92 : vector<16x512xf32> to vector<1x16x512xf32>
    tpu.vector_store %arg9[%c0_31, %c0_32, %c0_33], %95 {strides = array<i32>} : memref<1x16x512xf32, #tpu.memory_space<vmem>>, vector<1x16x512xf32>,
    return
  }
  func.func @transform_0(%arg0: i32) -> (i32, i32, i32) {
    %c0_i32 = arith.constant 0 : i32
    %c0_i32_0 = arith.constant 0 : i32
    %c0_i32_1 = arith.constant 0 : i32
    return %arg0, %c0_i32, %c0_i32_0 : i32, i32, i32
  }
  func.func @transform_1(%arg0: i32) -> (i32, i32) {
    %c0_i32 = arith.constant 0 : i32
    %c0_i32_0 = arith.constant 0 : i32
    %c0_i32_1 = arith.constant 0 : i32
    return %c0_i32, %c0_i32_0 : i32, i32
  }
  func.func @transform_2(%arg0: i32) -> (i32, i32) {
    %c0_i32 = arith.constant 0 : i32
    %c0_i32_0 = arith.constant 0 : i32
    %c0_i32_1 = arith.constant 0 : i32
    return %c0_i32, %c0_i32_0 : i32, i32
  }
  func.func @transform_3(%arg0: i32) -> (i32, i32) {
    %c0_i32 = arith.constant 0 : i32
    %c0_i32_0 = arith.constant 0 : i32
    %c0_i32_1 = arith.constant 0 : i32
    return %c0_i32, %c0_i32_0 : i32, i32
  }
  func.func @transform_4(%arg0: i32) -> (i32, i32, i32) {
    %c0_i32 = arith.constant 0 : i32
    %c0_i32_0 = arith.constant 0 : i32
    %c0_i32_1 = arith.constant 0 : i32
    %c0_i32_2 = arith.constant 0 : i32
    return %c0_i32, %c0_i32_0, %c0_i32_1 : i32, i32, i32
  }
  func.func @transform_5(%arg0: i32) -> (i32, i32) {
    %c0_i32 = arith.constant 0 : i32
    %c0_i32_0 = arith.constant 0 : i32
    %c0_i32_1 = arith.constant 0 : i32
    return %c0_i32, %c0_i32_0 : i32, i32
  }
  func.func @transform_6(%arg0: i32) -> (i32, i32) {
    %c0_i32 = arith.constant 0 : i32
    %c0_i32_0 = arith.constant 0 : i32
    %c0_i32_1 = arith.constant 0 : i32
    return %c0_i32, %c0_i32_0 : i32, i32
  }
  func.func @transform_7(%arg0: i32) -> (i32, i32) {
    %c0_i32 = arith.constant 0 : i32
    %c0_i32_0 = arith.constant 0 : i32
    %c0_i32_1 = arith.constant 0 : i32
    return %c0_i32, %c0_i32_0 : i32, i32
  }
  func.func @transform_8(%arg0: i32) -> (i32, i32, i32) {
    %c0_i32 = arith.constant 0 : i32
    %c0_i32_0 = arith.constant 0 : i32
    %c0_i32_1 = arith.constant 0 : i32
    return %arg0, %c0_i32, %c0_i32_0 : i32, i32, i32
  }
}

</mosaic_0001>

<bundles_post_ra>
// kernel: tpu_custom_call.1
= control target key start
LH: loop header
LB: loop body
LE: loop exit
PB: predicated region body
PF: predicated region fallthrough
CT: control target
= control target key end

     0   :  { %13 = vsyncpa [#allocation3], 0  ;;  %s2776_s0 = inlined_call_operand.vmem [shape: f32[1,16,512], index: 0, kind: input, shape index: {}]   ;;  %s2777_s1 = inlined_call_operand.hbm [shape: f32[9,512], index: 1, kind: input, shape index: {}]   ;;  %s2778_s2 = inlined_call_operand.vmem [shape: f32[4,16], index: 2, kind: input, shape index: {}]   ;;  %s2779_s3 = inlined_call_operand.vmem [shape: f32[4,1], index: 3, kind: input, shape index: {}]   ;;  %s2780_s4 = inlined_call_operand.vmem [shape: f32[9,4,4], index: 4, kind: input, shape index: {}]   ;;  %s2781_s5 = inlined_call_operand.vmem [shape: f32[4,1], index: 5, kind: input, shape index: {}]   ;;  %s2782_s6 = inlined_call_operand.vmem [shape: f32[16,4], index: 6, kind: input, shape index: {}]   ;;  %s2783_s7 = inlined_call_operand.vmem [shape: f32[16,1], index: 7, kind: input, shape index: {}]   ;;  %s2784_s8 = inlined_call_operand.hbm [shape: f32[1,16,512], index: 8, kind: output, shape index: {}]  }
   0x1   :  { %14 = vsyncpa [#allocation4], 0  ;;  %s2324_s27 = smov [#allocation2]   ;;  %s2276_s9 = scalar_lea.hbm %s2777_s1, 1024 }
   0x2   :  { %s22_s28 = sshll.u32 %s2324_s27, 4  ;;  %p2277_p0 = scmp.ne.s32.totalorder %s2777_s1, %s2276_s9  ;;  %s23_s28 = int_to_ptr.vmem [resolvable:$true] %s22_s28 }
   0x3   :  { %p2280_p1 = scmp.lt.u32.totalorder %s2276_s9, %s2777_s1 }
   0x5   :  { %p2282_p2 = pnand %p2280_p1, %p2277_p0 }
   0x7   :  { %2285 = shalt.err (!%p2282_p2)
}
   0x8   :  { %s2286_s14 = scalar_lea.vmem %s23_s28, 1024  ;;  %p2291_p4 = scmp.lt.s32.totalorder %s23_s28, %s23_s28 }
   0x9   :  { %p2287_p3 = scmp.ne.s32.totalorder %s23_s28, %s2286_s14  ;;  %p2292_p5 = scmp.lt.s32.totalorder %s2286_s14, %s2286_s14 }
   0xb   :  { %p2293_p6 = por %p2292_p5, %p2291_p4 }
   0xd   :  { %p2294_p7 = pnand %p2293_p6, %p2287_p3 }
   0xf   :  { %2297 = shalt.err (!%p2294_p7)
}
  0x10   :  { %s2325_s15 = smov 512   ;;  %s2326_s16 = smov 32  }
  0x11   :  { %28 = dma.hbm_to_vmem [thread:$0]  %s2777_s1, 1024, %s23_s28, [#allocation3], %s2325_s15, %s2325_s15, %s2326_s16  }
  0x12   :  { %2320 = dma.done.wait [#allocation3], 1024  }
  0x13   :  { %2321 = vsyncadd [#allocation3], 4294966272  ;;  %v2327_v0 = vmov 0.0   ;;  %v2328_v1 = vmov 0   ;;  %v2403_v2 = vld [vmem:[%s2776_s0 + $0x8] sm:$0xff]  ;;  %v2413_v4 = vld [vmem:[%s2776_s0 + $0x18] sm:$0xff]  ;;  %v236_v32 = vlaneseq }
  0x14   :  { %146 = vmatprep.mubr.f32.mxu0 %v2327_v0  ;;  %217 = vmatprep.mubr.f32.mxu1 %v2327_v0  ;;  %v2408_v3 = vld [vmem:[%s2776_s0 + $0x28] sm:$0xff]  ;;  %v2420_v6 = vld [vmem:[%s2776_s0 + $0x38] sm:$0xff]  ;;  %v2425_v7 = vld [vmem:[%s2776_s0] sm:$0xff]  ;;  %vm78_vm0 = vcmask 130048   ;;  %s2332_s18 = smov 1   ;;  %s2333_s19 = smov 127  }
  0x15   :  { %2274 = vset.pattern.permute.xlu0 %v2328_v1  ;;  %2275 = vset.pattern.permute.xlu1 %v2328_v1  ;;  %v2252_v5 = vpack.c.bf16 %v2408_v3, %v2403_v2  ;;  %v2430_v8 = vld [vmem:[%s2776_s0 + $0x20] sm:$0xff]  ;;  %v2256_v9 = vpack.c.bf16 %v2420_v6, %v2413_v4  ;;  %v2439_v11 = vld [vmem:[%s2776_s0 + $0x10] sm:$0xff]  ;;  %s2334_s20 = smov 113   ;;  %s2335_s21 = smov 112   ;;  %v1952_v31 = vld [vmem:[%s2783_s7 + $0x8] sm:$0xff]  ;;  %v2506_v33 = vand.u32 127, %v236_v32 }
  0x16   :  { %v2254_v10 = vpack.c.bf16 %v2430_v8, %v2425_v7  ;;  %v2444_v12 = vld [vmem:[%s2776_s0 + $0x30] sm:$0xff]  ;;  %v72_v14 = vld [vmem:[%s2779_s3] sm:$0xf]  ;;  %s2329_s0 = smov 17   ;;  %s2331_s3 = smov 15   ;;  %vm247_vm2 = vcmask 1043456  }
  0x17   :  { %2253 = vmatprep.subr.bf16.mxu0 %v2252_v5  ;;  %v2258_v13 = vpack.c.bf16 %v2444_v12, %v2439_v11  ;;  %2257 = vmatprep.subr.bf16.mxu1 %v2256_v9  ;;  %v60_v15 = vld [vmem:[%s2778_s2] sm:$0xf]  ;;  %s2330_s2 = smov 16   ;;  %s2336_s22 = smov 111   ;;  %vm238_vm1 = vcmp.lt.s32.totalorder %v2506_v33, 17  ;;  %vm243_vm3 = vcmask 31744  }
  0x18   :  { %2255 = vmatpush1.bf16.msra.mxu0 %v2254_v10  ;;  %75 = vperm.xlu0 %2274, %v72_v14   ;;  %v1951_v29 = vld [vmem:[%s2783_s7] sm:$0xff]  ;;  %vm587_vm4 = vcmp.lt.s32.totalorder %v2506_v33, 16  ;;  %v65_v58 = vld [vmem:[%s2780_s4 + $0x10] sm:$0xf]  ;;  %vm781_vm5 = vcmp.lt.s32.totalorder %v2506_v33, 15  ;;  %vm975_vm6 = vcmp.lt.s32.totalorder %v2506_v33, 1 }
  0x19   :  { %2259 = vmatpush1.bf16.msra.mxu1 %v2258_v13  ;;  %v1937_v30 = vld [vmem:[%s2781_s5] sm:$0xf]  ;;  %v62_v5 = vld [vmem:[%s2780_s4 + $0x4] sm:$0xf]  ;;  %vm1169_vm7 = vcmp.lt.s32.totalorder %v2506_v33, 127  ;;  %vm1363_vm8 = vcmp.lt.s32.totalorder %v2506_v33, 113 }
  0x1a   :  { %v61_v51 = vld [vmem:[%s2780_s4] sm:$0xf]  ;;  %vm1557_vm9 = vcmp.lt.s32.totalorder %v2506_v33, 112  ;;  %vm1751_vm10 = vcmp.lt.s32.totalorder %v2506_v33, 111 }
  0x1b   :  { %2184 = vmatmul.mubr.msk.f32.vlgmr.msra.gmra.mrb[0].mxu0 %vm78_vm0, %v60_v15  ;;  %v69_v33 = vld [vmem:[%s2780_s4 + $0x20] sm:$0xf] }
  0x1c   :  { %2185 = vmatmul.mubr.msk.f32.vlgmr.msra.gmra.mrb[0].mxu1 %vm78_vm0, %v60_v15  ;;  %324 = vmatprep.mubr.f32.mxu0 %v2327_v0 }
  0x1d   :  { %395 = vmatprep.mubr.f32.mxu1 %v2327_v0 }
  0x97   :  { %v76_v16 = vpop.permute.xlu0 %75 }
  0xee   :  { %v148_v17 = vpop.f32.mrb[0].mxu0 }
  0xef   :  { %v149_v18 = vadd.f32 %v148_v17, %v76_v16  ;;  %v219_v19 = vpop.f32.mrb[0].mxu1  ;;  %v150_v20 = vpop.f32.mrb[1].mxu0  ;;  %v63_v17 = vld [vmem:[%s2780_s4 + $0x8] sm:$0xf] }
  0xf0   :  { %v220_v21 = vadd.f32 %v219_v19, %v76_v16  ;;  %v221_v22 = vpop.f32.mrb[1].mxu1  ;;  %v151_v26 = vadd.f32 %v150_v20, %v76_v16 }
  0xf1   :  { %v2456_v23 = vmax.f32 %v149_v18, 0.0  ;;  %v222_v24 = vadd.f32 %v221_v22, %v76_v16 }
  0xf2   :  { %v2458_v25 = vmax.f32 %v220_v21, 0.0  ;;  %v2466_v28 = vmax.f32 %v151_v26, 0.0 }
  0xf3   :  { %228 = vrot.lane.b32.xlu0 %v2456_v23, %s2329_s0  ;;  %v2462_v27 = vmax.f32 %v222_v24, 0.0  ;;  %v64_v24 = vld [vmem:[%s2780_s4 + $0xc] sm:$0xf] }
  0xf4   :  { %232 = vrot.lane.b32.xlu1 %v2458_v25, %s2329_s0 }
  0xf7   :  { %234 = vrot.lane.b32.xlu0 %v2462_v27, %s2329_s0 }
  0xf8   :  { %579 = vrot.lane.b32.xlu1 %v2456_v23, %s2330_s2 }
  0xfb   :  { %581 = vrot.lane.b32.xlu0 %v2466_v28, %s2330_s2 }
  0xfc   :  { %583 = vrot.lane.b32.xlu1 %v2458_v25, %s2330_s2 }
  0xff   :  { %585 = vrot.lane.b32.xlu0 %v2462_v27, %s2330_s2 }
 0x100   :  { %773 = vrot.lane.b32.xlu1 %v2456_v23, %s2331_s3 }
 0x103   :  { %775 = vrot.lane.b32.xlu0 %v2466_v28, %s2331_s3 }
 0x104   :  { %777 = vrot.lane.b32.xlu1 %v2458_v25, %s2331_s3 }
 0x107   :  { %779 = vrot.lane.b32.xlu0 %v2462_v27, %s2331_s3 }
 0x108   :  { %967 = vrot.lane.b32.xlu1 %v2456_v23, %s2332_s18 }
 0x10b   :  { %969 = vrot.lane.b32.xlu0 %v2466_v28, %s2332_s18 }
 0x10c   :  { %971 = vrot.lane.b32.xlu1 %v2458_v25, %s2332_s18 }
 0x10f   :  { %973 = vrot.lane.b32.xlu0 %v2462_v27, %s2332_s18 }
 0x110   :  { %230 = vrot.lane.b32.xlu1 %v2466_v28, %s2329_s0 }
 0x113   :  { %1163 = vrot.lane.b32.xlu0 %v2466_v28, %s2333_s19 }
 0x114   :  { %1161 = vrot.lane.b32.xlu1 %v2456_v23, %s2333_s19 }
 0x117   :  { %1167 = vrot.lane.b32.xlu0 %v2462_v27, %s2333_s19 }
 0x118   :  { %1165 = vrot.lane.b32.xlu1 %v2458_v25, %s2333_s19 }
 0x11b   :  { %1357 = vrot.lane.b32.xlu0 %v2466_v28, %s2334_s20 }
 0x11c   :  { %1355 = vrot.lane.b32.xlu1 %v2456_v23, %s2334_s20 }
 0x11f   :  { %1361 = vrot.lane.b32.xlu0 %v2462_v27, %s2334_s20 }
 0x120   :  { %1359 = vrot.lane.b32.xlu1 %v2458_v25, %s2334_s20 }
 0x123   :  { %1551 = vrot.lane.b32.xlu0 %v2466_v28, %s2335_s21 }
 0x124   :  { %1549 = vrot.lane.b32.xlu1 %v2456_v23, %s2335_s21 }
 0x127   :  { %1555 = vrot.lane.b32.xlu0 %v2462_v27, %s2335_s21 }
 0x128   :  { %1553 = vrot.lane.b32.xlu1 %v2458_v25, %s2335_s21 }
 0x12b   :  { %1745 = vrot.lane.b32.xlu0 %v2466_v28, %s2336_s22 }
 0x12c   :  { %1743 = vrot.lane.b32.xlu1 %v2456_v23, %s2336_s22 }
 0x12f   :  { %1749 = vrot.lane.b32.xlu0 %v2462_v27, %s2336_s22 }
 0x130   :  { %1747 = vrot.lane.b32.xlu1 %v2458_v25, %s2336_s22 }
 0x133   :  { %1955 = vperm.xlu0 %2274, %v1951_v29  }
 0x134   :  { %1940 = vperm.xlu1 %2275, %v1937_v30  }
 0x138   :  { %1960 = vperm.xlu1 %2275, %v1952_v31   ;;  %v66_v31 = vld [vmem:[%s2780_s4 + $0x14] sm:$0xf] }
 0x165   :  { %v229_v34 = vpop.permute.xlu0 %228 }
 0x166   :  { %v233_v35 = vpop.permute.xlu1 %232 }
 0x169   :  { %v235_v36 = vpop.permute.xlu0 %234 }
 0x16a   :  { %v580_v37 = vpop.permute.xlu1 %579  ;;  %v239_v38 = vsel %vm238_vm1, %v233_v35, %v235_v36  ;;  %v242_v54 = vsel %vm238_vm1, %v235_v36, %v229_v34 }
 0x16b   :  { %2189 = vmatprep.subr.msk.mxu1 %vm247_vm2, %v239_v38 }
 0x16d   :  { %v582_v39 = vpop.permute.xlu0 %581 }
 0x16e   :  { %v584_v40 = vpop.permute.xlu1 %583  ;;  %v590_v59 = vsel %vm587_vm4, %v580_v37, %v582_v39 }
 0x16f   :  { %v589_v61 = vsel %vm587_vm4, %v582_v39, %v584_v40 }
 0x171   :  { %v586_v41 = vpop.permute.xlu0 %585 }
 0x172   :  { %v774_v42 = vpop.permute.xlu1 %773  ;;  %v588_v57 = vsel %vm587_vm4, %v584_v40, %v586_v41  ;;  %v591_v63 = vsel %vm587_vm4, %v586_v41, %v580_v37  ;;  %v67_v41 = vld [vmem:[%s2780_s4 + $0x18] sm:$0xf] }
 0x175   :  { %v776_v43 = vpop.permute.xlu0 %775 }
 0x176   :  { %v778_v44 = vpop.permute.xlu1 %777  ;;  %v784_v9 = vsel %vm781_vm5, %v774_v42, %v776_v43 }
 0x177   :  { %v783_v13 = vsel %vm781_vm5, %v776_v43, %v778_v44 }
 0x179   :  { %v780_v45 = vpop.permute.xlu0 %779 }
 0x17a   :  { %v2512_v46 = vpop.permute.xlu1 %967  ;;  %v782_v1 = vsel %vm781_vm5, %v778_v44, %v780_v45  ;;  %v785_v15 = vsel %vm781_vm5, %v780_v45, %v774_v42 }
 0x17d   :  { %v970_v47 = vpop.permute.xlu0 %969 }
 0x17e   :  { %v972_v48 = vpop.permute.xlu1 %971  ;;  %v978_v18 = vsel %vm975_vm6, %v2512_v46, %v970_v47 }
 0x17f   :  { %v977_v20 = vsel %vm975_vm6, %v970_v47, %v972_v48 }
 0x181   :  { %v2514_v49 = vpop.permute.xlu0 %973 }
 0x182   :  { %v231_v50 = vpop.permute.xlu1 %230  ;;  %v976_v16 = vsel %vm975_vm6, %v972_v48, %v2514_v49  ;;  %v979_v22 = vsel %vm975_vm6, %v2514_v49, %v2512_v46  ;;  %v68_v46 = vld [vmem:[%s2780_s4 + $0x1c] sm:$0xf] }
 0x183   :  { %v240_v52 = vsel %vm238_vm1, %v231_v50, %v233_v35  ;;  %v241_v53 = vsel %vm238_vm1, %v229_v34, %v231_v50 }
 0x184   :  { %2186 = vmatprep.subr.msk.mxu0 %vm247_vm2, %v241_v53  ;;  %2190 = vmatpush1.msk.msra.mxu1 %vm247_vm2, %v240_v52  ;;  %v2692_v53 = vshrl.u32 %v236_v32, 7 }
 0x185   :  { %2187 = vmatpush1.msk.msra.mxu0 %vm247_vm2, %v242_v54  ;;  %2191 = vmatmul.mubr.msk.f32.vlgmr.msra.gmra.mrb[2].mxu1 %vm243_vm3, %v61_v51  ;;  %v2530_v55 = vpop.permute.xlu0 %1163 }
 0x186   :  { %2195 = vmatprep.subr.msk.mxu1 %vm247_vm2, %v2462_v27  ;;  %v2534_v56 = vpop.permute.xlu1 %1161  ;;  %2188 = vmatmul.mubr.msk.f32.vlgmr.msra.gmra.mrb[2].mxu0 %vm243_vm3, %v61_v51  ;;  %v404_v54 = vsub.s32 0, %v2692_v53 }
 0x187   :  { %2192 = vmatprep.subr.msk.mxu0 %vm247_vm2, %v2466_v28  ;;  %2196 = vmatpush1.msk.msra.mxu1 %vm247_vm2, %v2458_v25  ;;  %v1172_v29 = vsel %vm1169_vm7, %v2534_v56, %v2530_v55 }
 0x188   :  { %2193 = vmatpush1.msk.msra.mxu0 %vm247_vm2, %v2456_v23  ;;  %2201 = vmatprep.subr.msk.mxu1 %vm247_vm2, %v588_v57  ;;  %v2698_v57 = vld [vmem:[#allocation2] sm:$0xff] }
 0x189   :  { %572 = vmatprep.mubr.f32.mxu1 %v2327_v0  ;;  %2198 = vmatprep.subr.msk.mxu0 %vm247_vm2, %v590_v59  ;;  %v1168_v60 = vpop.permute.xlu0 %1167  ;;  %v2702_v59 = vld [vmem:[#allocation2 + $0x8] sm:$0xff] }
 0x18a   :  { %501 = vmatprep.mubr.f32.mxu0 %v2327_v0  ;;  %2197 = vmatmul.mubr.msk.f32.vlgmr.msra.gmra.mrb[4].mxu1 %vm243_vm3, %v65_v58  ;;  %v1166_v62 = vpop.permute.xlu1 %1165  ;;  %v1173_v23 = vsel %vm1169_vm7, %v1168_v60, %v2534_v56 }
 0x18b   :  { %2202 = vmatpush1.msk.msra.mxu1 %vm247_vm2, %v589_v61  ;;  %2194 = vmatmul.mubr.msk.f32.vlgmr.msra.gmra.mrb[4].mxu0 %vm243_vm3, %v65_v58  ;;  %v1171_v25 = vsel %vm1169_vm7, %v2530_v55, %v1166_v62  ;;  %v1170_v27 = vsel %vm1169_vm7, %v1166_v62, %v1168_v60  ;;  %v2695_v55 = vld [vmem:[#allocation2 + $0x10] sm:$0xff]  ;;  %v2700_v58 = vld [vmem:[#allocation2 + $0x18] sm:$0xff]  ;;  %v405_v62 = vrot.slane %v2698_v57, %v404_v54 }
 0x18c   :  { %2199 = vmatpush1.msk.msra.mxu0 %vm247_vm2, %v591_v63  ;;  %2207 = vmatprep.subr.msk.mxu1 %vm247_vm2, %v782_v1  ;;  %v413_v56 = vrot.slane %v2695_v55, %v404_v54  ;;  %v417_v32 = vrot.slane %v2700_v58, %v404_v54 }
 0x18d   :  { %2204 = vmatprep.subr.msk.mxu0 %vm247_vm2, %v784_v9  ;;  %742 = vmatprep.mubr.f32.mxu1 %v2327_v0  ;;  %v1358_v10 = vpop.permute.xlu0 %1357  ;;  %v409_v9 = vrot.slane %v2702_v59, %v404_v54 }
 0x18e   :  { %671 = vmatprep.mubr.f32.mxu0 %v2327_v0  ;;  %2203 = vmatmul.mubr.msk.f32.vlgmr.msra.gmra.mrb[6].mxu1 %vm243_vm3, %v62_v5  ;;  %v1356_v14 = vpop.permute.xlu1 %1355 }
 0x18f   :  { %2208 = vmatpush1.msk.msra.mxu1 %vm247_vm2, %v783_v13  ;;  %2200 = vmatmul.mubr.msk.f32.vlgmr.msra.gmra.mrb[6].mxu0 %vm243_vm3, %v62_v5  ;;  %v1366_v39 = vsel %vm1363_vm8, %v1356_v14, %v1358_v10 }
 0x190   :  { %2205 = vmatpush1.msk.msra.mxu0 %vm247_vm2, %v785_v15  ;;  %2213 = vmatprep.subr.msk.mxu1 %vm247_vm2, %v976_v16 }
 0x191   :  { %2210 = vmatprep.subr.msk.mxu0 %vm247_vm2, %v978_v18  ;;  %936 = vmatprep.mubr.f32.mxu1 %v2327_v0  ;;  %v1362_v19 = vpop.permute.xlu0 %1361 }
 0x192   :  { %865 = vmatprep.mubr.f32.mxu0 %v2327_v0  ;;  %2209 = vmatmul.mubr.msk.f32.vlgmr.msra.gmra.mrb[8].mxu1 %vm243_vm3, %v63_v17  ;;  %v1360_v21 = vpop.permute.xlu1 %1359  ;;  %v1367_v30 = vsel %vm1363_vm8, %v1362_v19, %v1356_v14 }
 0x193   :  { %2214 = vmatpush1.msk.msra.mxu1 %vm247_vm2, %v977_v20  ;;  %2206 = vmatmul.mubr.msk.f32.vlgmr.msra.gmra.mrb[8].mxu0 %vm243_vm3, %v63_v17  ;;  %v1365_v34 = vsel %vm1363_vm8, %v1358_v10, %v1360_v21  ;;  %v1364_v36 = vsel %vm1363_vm8, %v1360_v21, %v1362_v19  ;;  %v751_v10 = vsub.s32 1, %v2692_v53  ;;  %v945_v21 = vsub.s32 2, %v2692_v53 }
 0x194   :  { %2211 = vmatpush1.msk.msra.mxu0 %vm247_vm2, %v979_v22  ;;  %2219 = vmatprep.subr.msk.mxu1 %vm247_vm2, %v1173_v23 }
 0x195   :  { %2216 = vmatprep.subr.msk.mxu0 %vm247_vm2, %v1171_v25  ;;  %1130 = vmatprep.mubr.f32.mxu1 %v2327_v0  ;;  %v1552_v26 = vpop.permute.xlu0 %1551  ;;  %v760_v20 = vrot.slane %v2695_v55, %v751_v10  ;;  %v752_v25 = vrot.slane %v2698_v57, %v751_v10 }
 0x196   :  { %1059 = vmatprep.mubr.f32.mxu0 %v2327_v0  ;;  %2215 = vmatmul.mubr.msk.f32.vlgmr.msra.gmra.mrb[10].mxu1 %vm243_vm3, %v64_v24  ;;  %v1550_v28 = vpop.permute.xlu1 %1549 }
 0x197   :  { %2220 = vmatpush1.msk.msra.mxu1 %vm247_vm2, %v1170_v27  ;;  %2212 = vmatmul.mubr.msk.f32.vlgmr.msra.gmra.mrb[10].mxu0 %vm243_vm3, %v64_v24  ;;  %v1560_v45 = vsel %vm1557_vm9, %v1550_v28, %v1552_v26 }
 0x198   :  { %2217 = vmatpush1.msk.msra.mxu0 %vm247_vm2, %v1172_v29  ;;  %2225 = vmatprep.subr.msk.mxu1 %vm247_vm2, %v1367_v30 }
 0x199   :  { %2222 = vmatprep.subr.msk.mxu0 %vm247_vm2, %v1365_v34  ;;  %1324 = vmatprep.mubr.f32.mxu1 %v2327_v0  ;;  %v1556_v35 = vpop.permute.xlu0 %1555 }
 0x19a   :  { %1253 = vmatprep.mubr.f32.mxu0 %v2327_v0  ;;  %2221 = vmatmul.mubr.msk.f32.vlgmr.msra.gmra.mrb[12].mxu1 %vm243_vm3, %v66_v31  ;;  %v1554_v37 = vpop.permute.xlu1 %1553  ;;  %v1561_v38 = vsel %vm1557_vm9, %v1556_v35, %v1550_v28  ;;  %v756_v28 = vrot.slane %v2702_v59, %v751_v10 }
 0x19b   :  { %2226 = vmatpush1.msk.msra.mxu1 %vm247_vm2, %v1364_v36  ;;  %v1559_v40 = vsel %vm1557_vm9, %v1552_v26, %v1554_v37  ;;  %2218 = vmatmul.mubr.msk.f32.vlgmr.msra.gmra.mrb[12].mxu0 %vm243_vm3, %v66_v31  ;;  %v1558_v42 = vsel %vm1557_vm9, %v1554_v37, %v1556_v35  ;;  %v764_v26 = vrot.slane %v2700_v58, %v751_v10  ;;  %v1139_v36 = vsub.s32 3, %v2692_v53 }
 0x19c   :  { %2223 = vmatpush1.msk.msra.mxu0 %vm247_vm2, %v1366_v39  ;;  %1518 = vmatprep.mubr.f32.mxu1 %v2327_v0  ;;  %v954_v35 = vrot.slane %v2695_v55, %v945_v21 }
 0x19d   :  { %2228 = vmatprep.subr.msk.mxu0 %vm247_vm2, %v1559_v40  ;;  %2231 = vmatprep.subr.msk.mxu1 %vm247_vm2, %v1561_v38  ;;  %v1746_v43 = vpop.permute.xlu0 %1745  ;;  %v946_v40 = vrot.slane %v2698_v57, %v945_v21 }
 0x19e   :  { %1447 = vmatprep.mubr.f32.mxu0 %v2327_v0  ;;  %2227 = vmatmul.mubr.msk.f32.vlgmr.msra.gmra.mrb[14].mxu1 %vm243_vm3, %v67_v41  ;;  %v1744_v44 = vpop.permute.xlu1 %1743 }
 0x19f   :  { %2232 = vmatpush1.msk.msra.mxu1 %vm247_vm2, %v1558_v42  ;;  %2224 = vmatmul.mubr.msk.f32.vlgmr.msra.gmra.mrb[14].mxu0 %vm243_vm3, %v67_v41  ;;  %v1754_v52 = vsel %vm1751_vm10, %v1744_v44, %v1746_v43  ;;  %v958_v41 = vrot.slane %v2700_v58, %v945_v21 }
 0x1a0   :  { %2229 = vmatpush1.msk.msra.mxu0 %vm247_vm2, %v1560_v45  ;;  %1712 = vmatprep.mubr.f32.mxu1 %v2327_v0 }
 0x1a1   :  { %1641 = vmatprep.mubr.f32.mxu0 %v2327_v0  ;;  %v1750_v47 = vpop.permute.xlu0 %1749 }
 0x1a2   :  { %2233 = vmatmul.mubr.msk.f32.vlgmr.msra.gmra.mrb[16].mxu1 %vm243_vm3, %v68_v46  ;;  %v1748_v48 = vpop.permute.xlu1 %1747  ;;  %v1755_v49 = vsel %vm1751_vm10, %v1750_v47, %v1744_v44  ;;  %v950_v44 = vrot.slane %v2702_v59, %v945_v21 }
 0x1a3   :  { %v1753_v50 = vsel %vm1751_vm10, %v1746_v43, %v1748_v48  ;;  %2230 = vmatmul.mubr.msk.f32.vlgmr.msra.gmra.mrb[16].mxu0 %vm243_vm3, %v68_v46  ;;  %v1752_v51 = vsel %vm1751_vm10, %v1748_v48, %v1750_v47  ;;  %2237 = vmatprep.subr.msk.mxu1 %vm247_vm2, %v1755_v49 }
 0x1a4   :  { %2234 = vmatprep.subr.msk.mxu0 %vm247_vm2, %v1753_v50  ;;  %1835 = vmatprep.mubr.f32.mxu0 %v2327_v0 }
 0x1a5   :  { %2235 = vmatpush1.msk.msra.mxu0 %vm247_vm2, %v1754_v52  ;;  %2238 = vmatpush1.msk.msra.mxu1 %vm247_vm2, %v1752_v51  ;;  %v1148_v52 = vrot.slane %v2695_v55, %v1139_v36 }
 0x1a6   :  { %1906 = vmatprep.mubr.f32.mxu1 %v2327_v0 }
 0x1a7   :  { %2236 = vmatmul.mubr.msk.f32.vlgmr.msra.gmra.mrb[18].mxu0 %vm243_vm3, %v69_v33  ;;  %2239 = vmatmul.mubr.msk.f32.vlgmr.msra.gmra.mrb[18].mxu1 %vm243_vm3, %v69_v33  ;;  %v1333_v33 = vsub.s32 5, %v2692_v53 }
 0x1a8   :  { %2045 = vmatprep.mubr.f32.mxu0 %v2327_v0  ;;  %2122 = vmatprep.mubr.f32.mxu1 %v2327_v0 }
 0x258   :  { %v397_v60 = vpop.f32.mrb[2].mxu1 }
 0x259   :  { %v326_v61 = vpop.f32.mrb[2].mxu0  ;;  %v399_v63 = vpop.f32.mrb[3].mxu1  ;;  %v420_v1 = vmul.f32 %v413_v56, %v397_v60 }
 0x25a   :  { %v328_v5 = vpop.f32.mrb[3].mxu0  ;;  %v418_v13 = vmul.f32 %v405_v62, %v326_v61  ;;  %v421_v14 = vmul.f32 %v417_v32, %v399_v63  ;;  %v1140_v61 = vrot.slane %v2698_v57, %v1139_v36  ;;  %v1152_v62 = vrot.slane %v2700_v58, %v1139_v36 }
 0x25b   :  { %v419_v16 = vmul.f32 %v409_v9, %v328_v5 }
 0x25d   :  { %v574_v15 = vpop.f32.mrb[4].mxu1 }
 0x25e   :  { %v575_v17 = vadd.f32 %v574_v15, %v420_v1  ;;  %v503_v18 = vpop.f32.mrb[4].mxu0  ;;  %v576_v19 = vpop.f32.mrb[5].mxu1  ;;  %v1144_v1 = vrot.slane %v2702_v59, %v1139_v36 }
 0x25f   :  { %v504_v22 = vadd.f32 %v503_v18, %v418_v13  ;;  %v577_v23 = vadd.f32 %v576_v19, %v421_v14  ;;  %v505_v24 = vpop.f32.mrb[5].mxu0  ;;  %v1527_v18 = vsub.s32 6, %v2692_v53 }
 0x260   :  { %v506_v27 = vadd.f32 %v505_v24, %v419_v16 }
 0x261   :  { %v744_v29 = vpop.f32.mrb[6].mxu1  ;;  %v1536_v36 = vrot.slane %v2695_v55, %v1527_v18 }
 0x262   :  { %v767_v30 = vmul.f32 %v760_v20, %v744_v29  ;;  %v673_v31 = vpop.f32.mrb[6].mxu0  ;;  %v746_v34 = vpop.f32.mrb[7].mxu1 }
 0x263   :  { %v765_v37 = vmul.f32 %v752_v25, %v673_v31  ;;  %v768_v38 = vmul.f32 %v764_v26, %v746_v34  ;;  %v675_v39 = vpop.f32.mrb[7].mxu0  ;;  %v1338_v26 = vrot.slane %v2702_v59, %v1333_v33 }
 0x264   :  { %v771_v42 = vadd.f32 %v767_v30, %v575_v17  ;;  %v766_v43 = vmul.f32 %v756_v28, %v675_v39  ;;  %v1342_v17 = vrot.slane %v2695_v55, %v1333_v33 }
 0x265   :  { %v769_v45 = vadd.f32 %v765_v37, %v504_v22  ;;  %v772_v46 = vadd.f32 %v768_v38, %v577_v23  ;;  %v938_v47 = vpop.f32.mrb[8].mxu1  ;;  %v1334_v22 = vrot.slane %v2698_v57, %v1333_v33  ;;  %v1346_v23 = vrot.slane %v2700_v58, %v1333_v33 }
 0x266   :  { %v770_v48 = vadd.f32 %v766_v43, %v506_v27  ;;  %v961_v49 = vmul.f32 %v954_v35, %v938_v47  ;;  %v867_v50 = vpop.f32.mrb[8].mxu0  ;;  %v940_v51 = vpop.f32.mrb[9].mxu1  ;;  %v1721_v37 = vsub.s32 7, %v2692_v53 }
 0x267   :  { %v959_v54 = vmul.f32 %v946_v40, %v867_v50  ;;  %v962_v56 = vmul.f32 %v958_v41, %v940_v51  ;;  %v869_v60 = vpop.f32.mrb[9].mxu0  ;;  %v1528_v41 = vrot.slane %v2698_v57, %v1527_v18 }
 0x268   :  { %v965_v63 = vadd.f32 %v961_v49, %v771_v42  ;;  %v960_v32 = vmul.f32 %v950_v44, %v869_v60  ;;  %v1540_v42 = vrot.slane %v2700_v58, %v1527_v18  ;;  %v1730_v53 = vrot.slane %v2695_v55, %v1721_v37 }
 0x269   :  { %v963_v5 = vadd.f32 %v959_v54, %v769_v45  ;;  %v966_v9 = vadd.f32 %v962_v56, %v772_v46  ;;  %v1132_v10 = vpop.f32.mrb[10].mxu1  ;;  %v1532_v45 = vrot.slane %v2702_v59, %v1527_v18  ;;  %v1722_v60 = vrot.slane %v2698_v57, %v1721_v37  ;;  %v2242_v57 = vld [vmem:[#allocation2 + $0x30] ss:$0 sm:$0xff] }
 0x26a   :  { %v964_v13 = vadd.f32 %v960_v32, %v770_v48  ;;  %v1155_v14 = vmul.f32 %v1148_v52, %v1132_v10  ;;  %v1061_v15 = vpop.f32.mrb[10].mxu0  ;;  %v1134_v16 = vpop.f32.mrb[11].mxu1  ;;  %v1726_v32 = vrot.slane %v2702_v59, %v1721_v37 }
 0x26b   :  { %v1153_v19 = vmul.f32 %v1140_v61, %v1061_v15  ;;  %v1156_v20 = vmul.f32 %v1152_v62, %v1134_v16  ;;  %v1063_v21 = vpop.f32.mrb[11].mxu0  ;;  %v1734_v61 = vrot.slane %v2700_v58, %v1721_v37 }
 0x26c   :  { %v1159_v24 = vadd.f32 %v1155_v14, %v965_v63  ;;  %v1154_v25 = vmul.f32 %v1144_v1, %v1063_v21 }
 0x26d   :  { %v1157_v27 = vadd.f32 %v1153_v19, %v963_v5  ;;  %v1160_v28 = vadd.f32 %v1156_v20, %v966_v9  ;;  %v1326_v29 = vpop.f32.mrb[12].mxu1  ;;  %v2240_v20 = vld [vmem:[#allocation2 + $0x20] ss:$0 sm:$0xff] }
 0x26e   :  { %v1158_v30 = vadd.f32 %v1154_v25, %v964_v13  ;;  %v1349_v31 = vmul.f32 %v1342_v17, %v1326_v29  ;;  %v1255_v34 = vpop.f32.mrb[12].mxu0  ;;  %v1328_v35 = vpop.f32.mrb[13].mxu1 }
 0x26f   :  { %v1347_v38 = vmul.f32 %v1334_v22, %v1255_v34  ;;  %v1350_v39 = vmul.f32 %v1346_v23, %v1328_v35  ;;  %v1257_v40 = vpop.f32.mrb[13].mxu0  ;;  %v2241_v22 = vld [vmem:[#allocation2 + $0x28] ss:$0 sm:$0xff]  ;;  %v2243_v23 = vld [vmem:[#allocation2 + $0x38] ss:$0 sm:$0xff] }
 0x270   :  { %v1353_v43 = vadd.f32 %v1349_v31, %v1159_v24  ;;  %v1348_v44 = vmul.f32 %v1338_v26, %v1257_v40 }
 0x271   :  { %v1351_v46 = vadd.f32 %v1347_v38, %v1157_v27  ;;  %v1354_v47 = vadd.f32 %v1350_v39, %v1160_v28  ;;  %v1520_v48 = vpop.f32.mrb[14].mxu1 }
 0x272   :  { %v1352_v49 = vadd.f32 %v1348_v44, %v1158_v30  ;;  %v1543_v50 = vmul.f32 %v1536_v36, %v1520_v48  ;;  %v1449_v51 = vpop.f32.mrb[14].mxu0  ;;  %v1522_v52 = vpop.f32.mrb[15].mxu1  ;;  %v71_v48 = vld [vmem:[%s2782_s6 + $0x8] sm:$0xff] }
 0x273   :  { %v1541_v33 = vmul.f32 %v1528_v41, %v1449_v51  ;;  %v1544_v54 = vmul.f32 %v1540_v42, %v1522_v52  ;;  %v1451_v56 = vpop.f32.mrb[15].mxu0  ;;  %v1941_v36 = vpop.permute.xlu1 %1940 }
 0x274   :  { %v1547_v62 = vadd.f32 %v1543_v50, %v1353_v43  ;;  %v1542_v63 = vmul.f32 %v1532_v45, %v1451_v56 }
 0x275   :  { %v1545_v1 = vadd.f32 %v1541_v33, %v1351_v46  ;;  %v1548_v5 = vadd.f32 %v1544_v54, %v1354_v47  ;;  %v1714_v9 = vpop.f32.mrb[16].mxu1  ;;  %v70_v47 = vld [vmem:[%s2782_s6] sm:$0xff]  ;;  %s2337_s6 = smov [#allocation5]  }
 0x276   :  { %v1546_v10 = vadd.f32 %v1542_v63, %v1352_v49  ;;  %v1737_v13 = vmul.f32 %v1730_v53, %v1714_v9  ;;  %v1643_v14 = vpop.f32.mrb[16].mxu0  ;;  %v1716_v15 = vpop.f32.mrb[17].mxu1  ;;  %s2172_s23 = sshll.u32 %s2337_s6, 4  ;;  %s2173_s23 = int_to_ptr.vmem [resolvable:$true] %s2172_s23 }
 0x277   :  { %v1735_v16 = vmul.f32 %v1722_v60, %v1643_v14  ;;  %v1738_v55 = vmul.f32 %v1734_v61, %v1716_v15  ;;  %v1645_v17 = vpop.f32.mrb[17].mxu0  ;;  %v1956_v49 = vpop.permute.xlu0 %1955  ;;  %s2298_s24 = scalar_lea.vmem %s2173_s23, 1024  ;;  %p2303_p9 = scmp.lt.s32.totalorder %s2173_s23, %s2173_s23 }
 0x278   :  { %v1741_v18 = vadd.f32 %v1737_v13, %v1547_v62  ;;  %v1736_v19 = vmul.f32 %v1726_v32, %v1645_v17  ;;  %v1961_v61 = vpop.permute.xlu1 %1960  ;;  %p2299_p8 = scmp.ne.s32.totalorder %s2173_s23, %s2298_s24  ;;  %p2304_p10 = scmp.lt.s32.totalorder %s2298_s24, %s2298_s24 }
 0x279   :  { %v1739_v21 = vadd.f32 %v1735_v16, %v1545_v1  ;;  %v1742_v58 = vadd.f32 %v1738_v55, %v1548_v5 }
 0x27a   :  { %v1740_v24 = vadd.f32 %v1736_v19, %v1546_v10  ;;  %v1837_v59 = vpop.f32.mrb[18].mxu0  ;;  %v1908_v25 = vpop.f32.mrb[18].mxu1  ;;  %p2305_p11 = por %p2304_p10, %p2303_p9 }
 0x27b   :  { %v1929_v26 = vmul.f32 %v2240_v20, %v1837_v59  ;;  %v1931_v27 = vmul.f32 %v2242_v57, %v1908_v25  ;;  %v1839_v28 = vpop.f32.mrb[19].mxu0  ;;  %v1910_v29 = vpop.f32.mrb[19].mxu1 }
 0x27c   :  { %v1930_v30 = vmul.f32 %v2241_v22, %v1839_v28  ;;  %v1932_v31 = vmul.f32 %v2243_v23, %v1910_v29  ;;  %p2306_p12 = pnand %p2305_p11, %p2299_p8 }
 0x27d   :  { %v1933_v34 = vadd.f32 %v1929_v26, %v1739_v21  ;;  %v1935_v35 = vadd.f32 %v1931_v27, %v1741_v18 }
 0x27e   :  { %v1934_v37 = vadd.f32 %v1930_v30, %v1740_v24  ;;  %v1936_v38 = vadd.f32 %v1932_v31, %v1742_v58 }
 0x27f   :  { %v1943_v39 = vadd.f32 %v1941_v36, %v1933_v34  ;;  %v1945_v40 = vadd.f32 %v1941_v36, %v1935_v35 }
 0x280   :  { %v1944_v41 = vadd.f32 %v1941_v36, %v1934_v37  ;;  %v1946_v42 = vadd.f32 %v1941_v36, %v1936_v38 }
 0x281   :  { %v1947_v45 = vmax.f32 %v1943_v39, 0.0  ;;  %v1949_v46 = vmax.f32 %v1945_v40, 0.0 }
 0x282   :  { %v1948_v43 = vmax.f32 %v1944_v41, 0.0  ;;  %v1950_v44 = vmax.f32 %v1946_v42, 0.0 }
 0x284   :  { %2244 = vmatprep.subr.msk.mxu0 %vm247_vm2, %v1948_v43  ;;  %2248 = vmatprep.subr.msk.mxu1 %vm247_vm2, %v1950_v44 }
 0x285   :  { %2245 = vmatpush1.msk.msra.mxu0 %vm247_vm2, %v1947_v45  ;;  %2249 = vmatpush1.msk.msra.mxu1 %vm247_vm2, %v1949_v46 }
 0x286   :  { %2246 = vmatmul.mubr.msk.f32.vlgmr.msra.gmra.mrb[20].mxu0 %vm243_vm3, %v70_v47  ;;  %2250 = vmatmul.mubr.msk.f32.vlgmr.msra.gmra.mrb[20].mxu1 %vm243_vm3, %v70_v47 }
 0x287   :  { %2051 = vmatprep.mubr.f32.mxu0 %v2327_v0  ;;  %2128 = vmatprep.mubr.f32.mxu1 %v2327_v0 }
 0x28a   :  { %2247 = vmatmul.mubr.msk.f32.gmra.mrb[22].mxu0 %vm243_vm3, %v71_v48  ;;  %2251 = vmatmul.mubr.msk.f32.gmra.mrb[22].mxu1 %vm243_vm3, %v71_v48 }
 0x359   :  { %v2047_v50 = vpop.f32.mrb[20].mxu0  ;;  %v2124_v51 = vpop.f32.mrb[20].mxu1 }
 0x35a   :  { %v2048_v52 = vadd.f32 %v2047_v50, %v1956_v49  ;;  %v2125_v53 = vadd.f32 %v2124_v51, %v1956_v49  ;;  %v2049_v33 = vpop.f32.mrb[21].mxu0  ;;  %v2126_v54 = vpop.f32.mrb[21].mxu1 }
 0x35b   :  { %v2050_v56 = vadd.f32 %v2049_v33, %v1956_v49  ;;  %v2127_v60 = vadd.f32 %v2126_v54, %v1956_v49 }
 0x35c   :  { %v2135_v62 = vmax.f32 %v2048_v52, 0.0  ;;  %v2137_v0 = vmax.f32 %v2125_v53, 0.0 }
 0x35d   :  { %v2136_v63 = vmax.f32 %v2050_v56, 0.0  ;;  %v2138_v32 = vmax.f32 %v2127_v60, 0.0  ;;  %v2053_v1 = vpop.f32.mrb[22].mxu0  ;;  %v2130_v5 = vpop.f32.mrb[22].mxu1 }
 0x35e   :  { %v2143_v9 = vadd.f32 %v2135_v62, %v2425_v7  ;;  %v2145_v10 = vadd.f32 %v2137_v0, %v2439_v11  ;;  %v2054_v13 = vadd.f32 %v2053_v1, %v1961_v61  ;;  %v2131_v14 = vadd.f32 %v2130_v5, %v1961_v61  ;;  %v2055_v15 = vpop.f32.mrb[23].mxu0  ;;  %v2132_v16 = vpop.f32.mrb[23].mxu1 }
 0x35f   :  { %v2144_v55 = vadd.f32 %v2136_v63, %v2403_v2  ;;  %v2146_v17 = vadd.f32 %v2138_v32, %v2413_v4  ;;  %v2056_v18 = vadd.f32 %v2055_v15, %v1961_v61  ;;  %v2133_v19 = vadd.f32 %v2132_v16, %v1961_v61 }
 0x360   :  { %v2151_v20 = vmax.f32 %v2143_v9, 0.0  ;;  %v2153_v57 = vmax.f32 %v2145_v10, 0.0  ;;  %v2139_v21 = vmax.f32 %v2054_v13, 0.0  ;;  %v2141_v58 = vmax.f32 %v2131_v14, 0.0 }
 0x361   :  { %v2152_v22 = vmax.f32 %v2144_v55, 0.0  ;;  %v2154_v23 = vmax.f32 %v2146_v17, 0.0  ;;  %v2140_v24 = vmax.f32 %v2056_v18, 0.0  ;;  %v2142_v7 = vmax.f32 %v2133_v19, 0.0 }
 0x362   :  { %2159 = vst [vmem:[#allocation5] sm:$0xff] %v2151_v20  ;;  %2161 = vst [vmem:[#allocation5 + $0x10] sm:$0xff] %v2153_v57  ;;  %v2147_v11 = vadd.f32 %v2139_v21, %v2430_v8  ;;  %v2149_v59 = vadd.f32 %v2141_v58, %v2444_v12 }
 0x363   :  { %2160 = vst [vmem:[#allocation5 + $0x8] sm:$0xff] %v2152_v22  ;;  %2162 = vst [vmem:[#allocation5 + $0x18] sm:$0xff] %v2154_v23  ;;  %v2148_v2 = vadd.f32 %v2140_v24, %v2408_v3  ;;  %v2150_v4 = vadd.f32 %v2142_v7, %v2420_v6 }
 0x364   :  { %v2155_v25 = vmax.f32 %v2147_v11, 0.0  ;;  %v2157_v26 = vmax.f32 %v2149_v59, 0.0 }
 0x365   :  { %v2156_v27 = vmax.f32 %v2148_v2, 0.0  ;;  %v2158_v28 = vmax.f32 %v2150_v4, 0.0 }
 0x366   :  { %2163 = vst [vmem:[#allocation5 + $0x20] sm:$0xff] %v2155_v25  ;;  %2165 = vst [vmem:[#allocation5 + $0x30] sm:$0xff] %v2157_v26 }
 0x367   :  { %2164 = vst [vmem:[#allocation5 + $0x28] sm:$0xff] %v2156_v27  ;;  %2166 = vst [vmem:[#allocation5 + $0x38] sm:$0xff] %v2158_v28 }
 0x368   :  { %2309 = shalt.err (!%p2306_p12)
}
 0x369   :  { %s2310_s27 = scalar_lea.hbm %s2784_s8, 1024 }
 0x36a   :  { %p2311_p13 = scmp.ne.s32.totalorder %s2784_s8, %s2310_s27  ;;  %p2314_p0 = scmp.lt.u32.totalorder %s2310_s27, %s2784_s8 }
 0x36c   :  { %p2316_p1 = pnand %p2314_p0, %p2311_p13 }
 0x36e   :  { %2319 = shalt.err (!%p2316_p1)
}
 0x36f   :  { %2178 = dma.vmem_to_hbm [thread:$0]  %s2173_s23, 1024, %s2784_s8, [#allocation4], %s2325_s15, %s2325_s15, %s2326_s16  }
 0x370   :  { %2322 = dma.done.wait [#allocation4], 1024  }
 0x371   :  { %2323 = vsyncadd [#allocation4], 4294966272 }
 0x372   :  { %2182 = vsyncpa [#allocation3], 1 }
 0x373   :  { %2183 = vsyncpa [#allocation4], 1 }

</bundles_post_ra>
